<compile_context>
chip_gen: v6e
topology: v6e:2x2x1
jax: 0.10.0
libtpu: 0.0.40
codegen_flags: <defaults>
</compile_context>

<pallas_src>
import functools

import jax
import jax.numpy as jnp
from jax.experimental import pallas as pl
from jax.experimental.pallas import tpu as pltpu


_LANE = 128


def _round_up(x, m):
    return ((x + m - 1) // m) * m


def _cdiv(a, b):
    return -(-a // b)


def _vmem_capacity_bytes():
    try:
        return int(pltpu.get_tpu_info().vmem_capacity_bytes)
    except Exception:
        return 64 * 1024 * 1024  # conservative default: v7x physical VMEM


def _supports_single_buffering():
    if not hasattr(pl, "Buffered"):
        return False
    try:
        import inspect
        return "pipeline_mode" in inspect.signature(pl.BlockSpec).parameters
    except Exception:
        return False


_HAS_BUFFERED = _supports_single_buffering()


def _compiler_params(needed_bytes, semantics):
    cap = _vmem_capacity_bytes()
    limit = max(32 * 1024 * 1024, int(needed_bytes) + (4 << 20))
    limit = min(limit, int(cap * 0.9))
    return pltpu.CompilerParams(
        dimension_semantics=semantics,
        vmem_limit_bytes=limit,
    )


# --------------------------------------------------------------------------
# Kernels
# --------------------------------------------------------------------------

def _arm_per_batch_kernel(x_ref, w_ref, b_ref, o_ref, *, inv_hw):
    # x_ref/o_ref: (1, C, HW);  w_ref: (C_out, C_in);  b_ref: (C, 1).
    # Pool in f32 straight off the ref (no f32 slab copy); the 1/(H*W) scale
    # is applied to the f32 sum and the tiny gate matmul stays in f32 (no
    # precision loss when the weight/input are bf16).
    psum = jnp.sum(x_ref[0], axis=-1, keepdims=True,
                   dtype=jnp.float32) * inv_hw                        # (C, 1)
    gate = jnp.dot(w_ref[...].astype(jnp.float32), psum,
                   preferred_element_type=jnp.float32)                # (C, 1)
    gate = jax.nn.sigmoid(gate + b_ref[...].astype(jnp.float32))
    # Fused multiply-store in the input dtype (no intermediate f32 slab).
    o_ref[0] = x_ref[0] * gate.astype(o_ref.dtype)


def _arm_pool_kernel(x_ref, psum_ref, *, hw, tile, needs_mask):
    # Pass 1 of the tiled path: per-(batch, spatial-split) pooled sums.
    # grid = (B, S, n_ts), reduction axis (t) last.  The tiny f32 output block
    # is revisited across t and used directly as the accumulator.
    # x_ref: (1, C, T);  psum_ref: (1, 1, C, 1) f32.
    t = pl.program_id(2)

    @pl.when(t == 0)
    def _():
        psum_ref[...] = jnp.zeros_like(psum_ref)

    xv = x_ref[0]                                                     # (C, T)
    if needs_mask:
        s = pl.program_id(1)
        start = (s * pl.num_programs(2) + t) * tile
        lane = jax.lax.broadcasted_iota(jnp.int32, xv.shape, 1) + start
        xv = jnp.where(lane < hw, xv, 0)
    psum_ref[0, 0] += jnp.sum(xv, axis=-1, keepdims=True, dtype=jnp.float32)


def _arm_scale_kernel(x_ref, g_ref, o_ref):
    # Pass 2 of the tiled path.  grid = (B, n_t), both axes parallel.
    # x_ref/o_ref: (1, C, T);  g_ref: (1, C, 1) f32.
    o_ref[0] = x_ref[0] * g_ref[0].astype(o_ref.dtype)


# --------------------------------------------------------------------------
# Wrapper
# --------------------------------------------------------------------------

def arm_forward(x, weight, bias, *, force_path=None, tile_lanes=None,
                donate_input=False):
    """ARM forward: out = x * sigmoid(Conv1x1(global_avg_pool(x))).

    x: (B, C, H, W);  weight: (C, C) (out_ch, in_ch) -- a (C, C, 1, 1) conv
    weight is accepted too;  bias: (C,).

    donate_input=True aliases the output onto x's buffer for the rescale step
    (input_output_aliases={0: 0}); only use it if the caller donates x.
    """
    B, C, H, W = x.shape
    HW = H * W
    if weight.ndim == 4:
        weight = weight.reshape(weight.shape[0], weight.shape[1])
    xbytes = x.dtype.itemsize

    bias2d = bias.reshape(C, 1)

    # Conservative VMEM accounting (the lane axis is padded to 128 in VMEM
    # even though we never pad in HBM).
    hw_lanes = _round_up(HW, _LANE)
    slab = C * hw_lanes * xbytes
    param_bytes = 2 * (C * C * weight.dtype.itemsize + C * bias.dtype.itemsize)
    budget = int(0.75 * _vmem_capacity_bytes())

    need_db = 4 * slab + param_bytes          # double-buffered in + out
    need_sb = 2 * slab + param_bytes          # single-buffered in + out

    if force_path is not None:
        path = force_path
        if path == "per_batch_sb" and not _HAS_BUFFERED:
            path = "per_batch"
    elif need_db <= budget:
        path = "per_batch"
    elif _HAS_BUFFERED and need_sb <= budget:
        path = "per_batch_sb"
    else:
        path = "tiled"

    x_flat = x.reshape(B, C, HW)              # metadata-only reshape, no copy
    io_alias = {0: 0} if donate_input else {}

    # ---------------- single-pass per-batch paths ----------------
    if path in ("per_batch", "per_batch_sb"):
        spec_kw = {}
        if path == "per_batch_sb":
            spec_kw = dict(pipeline_mode=pl.Buffered(1))
        out = pl.pallas_call(
            functools.partial(_arm_per_batch_kernel, inv_hw=1.0 / HW),
            out_shape=jax.ShapeDtypeStruct((B, C, HW), x.dtype),
            grid_spec=pltpu.PrefetchScalarGridSpec(
                num_scalar_prefetch=0,
                grid=(B,),
                in_specs=[
                    pl.BlockSpec((1, C, HW), lambda b: (b, 0, 0), **spec_kw),
                    pl.BlockSpec((C, C), lambda b: (0, 0)),
                    pl.BlockSpec((C, 1), lambda b: (0, 0)),
                ],
                out_specs=pl.BlockSpec((1, C, HW), lambda b: (b, 0, 0),
                                       **spec_kw),
            ),
            compiler_params=_compiler_params(
                need_sb if path == "per_batch_sb" else need_db, ("parallel",)),
            input_output_aliases=io_alias,
        )(x_flat, weight, bias2d)
        return out.reshape(B, C, H, W)

    # ---------------- tiled two-pass fallback ----------------
    # Lane-tile size: per-call VMEM peak is ~4*C*T*xbytes for pass 2
    # (double-buffered in + out); pass 1 (~2*C*T) is strictly smaller.
    if tile_lanes is not None:
        T = max(_LANE, _round_up(int(tile_lanes), _LANE))
    else:
        T = max(_LANE, (budget // (4 * C * xbytes) // _LANE) * _LANE)
    T = min(T, hw_lanes)
    n_t = _cdiv(HW, T)

    # With B == 1 a megacore chip (v7x) would otherwise run the whole pooling
    # pass on one TensorCore; split the spatial reduction 2-way.  Keep the
    # tile count even so both splits get whole tiles (no fully-OOB blocks).
    S = 1
    if B == 1 and n_t >= 2:
        t_adj = T
        while t_adj > _LANE and _cdiv(HW, t_adj) % 2 != 0:
            t_adj -= _LANE
        if _cdiv(HW, t_adj) % 2 == 0:
            T, n_t, S = t_adj, _cdiv(HW, t_adj), 2
    n_ts = n_t // S
    needs_mask = (T * n_t != HW)

    pool_need = 2 * C * T * xbytes + 8 * C * 4
    psums = pl.pallas_call(
        functools.partial(_arm_pool_kernel, hw=HW, tile=T,
                          needs_mask=needs_mask),
        out_shape=jax.ShapeDtypeStruct((B, S, C, 1), jnp.float32),
        grid_spec=pltpu.PrefetchScalarGridSpec(
            num_scalar_prefetch=0,
            grid=(B, S, n_ts),
            in_specs=[pl.BlockSpec((1, C, T),
                                   lambda b, s, t: (b, 0, s * n_ts + t))],
            out_specs=pl.BlockSpec((1, 1, C, 1), lambda b, s, t: (b, s, 0, 0)),
        ),
        compiler_params=_compiler_params(
            pool_need, ("parallel", "parallel", "arbitrary")),
    )(x_flat)

    # Tiny gate: (B,C)x(C,C) matmul + bias + sigmoid in plain-JAX f32.  Keeping
    # it outside the kernels frees the parameter buffers from pass 1 so T can
    # be as large as VMEM allows.
    pooled = jnp.sum(psums[..., 0], axis=1) * (1.0 / HW)              # (B, C)
    gate = jax.nn.sigmoid(
        pooled @ weight.astype(jnp.float32).T
        + bias.astype(jnp.float32)[None, :])[:, :, None]              # (B,C,1)

    scale_need = 4 * C * T * xbytes + 8 * C * 4
    out = pl.pallas_call(
        _arm_scale_kernel,
        out_shape=jax.ShapeDtypeStruct((B, C, HW), x.dtype),
        grid_spec=pltpu.PrefetchScalarGridSpec(
            num_scalar_prefetch=0,
            grid=(B, n_t),
            in_specs=[
                pl.BlockSpec((1, C, T), lambda b, t: (b, 0, t)),
                pl.BlockSpec((1, C, 1), lambda b, t: (b, 0, 0)),
            ],
            out_specs=pl.BlockSpec((1, C, T), lambda b, t: (b, 0, t)),
        ),
        compiler_params=_compiler_params(scale_need, ("parallel", "parallel")),
        input_output_aliases=io_alias,
    )(x_flat, gate)
    return out.reshape(B, C, H, W)


def arm_reference(x, weight, bias):
    # pure-JAX reference for the ARM forward pass
    xf = x.astype(jnp.float32)
    pooled = jnp.mean(xf, axis=(2, 3), keepdims=True)                 # (B,C,1,1)
    y = jnp.einsum("oc,bcij->boij", weight.astype(jnp.float32), pooled)
    y = y + bias.astype(jnp.float32)[None, :, None, None]
    y = jax.nn.sigmoid(y)
    return (xf * y).astype(x.dtype)


if __name__ == "__main__":
    key = jax.random.PRNGKey(0)
    kx, kw, kb = jax.random.split(key, 3)

    B, C, H, W = 2, 8, 16, 16
    x = jax.random.normal(kx, (B, C, H, W), dtype=jnp.float32)
    weight = jax.random.normal(kw, (C, C), dtype=jnp.float32) * 0.1
    bias = jax.random.normal(kb, (C,), dtype=jnp.float32) * 0.1
    ref = arm_reference(x, weight, bias)

    # Auto path: single-pass per-batch slab (no wrapper padding / slicing).
    out = jax.block_until_ready(arm_forward(x, weight, bias))
    assert out.shape == (B, C, H, W)
    assert jnp.allclose(out, ref, atol=1e-5, rtol=1e-5)

    # Single-buffered per-batch path (v7x VMEM saver), if this jax exposes it.
    if _HAS_BUFFERED:
        out_sb = jax.block_until_ready(
            arm_forward(x, weight, bias, force_path="per_batch_sb"))
        assert jnp.allclose(out_sb, ref, atol=1e-5, rtol=1e-5)

    # Two-pass tiled path (forced small tile so the reduction spans tiles).
    out_t = jax.block_until_ready(
        arm_forward(x, weight, bias, force_path="tiled", tile_lanes=128))
    assert jnp.allclose(out_t, ref, atol=1e-5, rtol=1e-5)

    # B == 1 tiled path: exercises the 2-way spatial split of the pooling pass.
    x1 = jax.random.normal(kx, (1, C, 16, 16), dtype=jnp.float32)
    ref1 = arm_reference(x1, weight, bias)
    out1 = jax.block_until_ready(
        arm_forward(x1, weight, bias, force_path="tiled", tile_lanes=128))
    assert jnp.allclose(out1, ref1, atol=1e-5, rtol=1e-5)

    # Non-128-multiple spatial size on the single-pass path (no padding copy).
    x2 = jax.random.normal(kx, (B, C, 7, 7), dtype=jnp.float32)
    ref2 = arm_reference(x2, weight, bias)
    out2 = jax.block_until_ready(arm_forward(x2, weight, bias))
    assert jnp.allclose(out2, ref2, atol=1e-5, rtol=1e-5)

    # Ragged last tile on the tiled path (in-kernel mask + partial blocks).
    x3 = jax.random.normal(kx, (B, C, 10, 13), dtype=jnp.float32)
    ref3 = arm_reference(x3, weight, bias)
    out3 = jax.block_until_ready(
        arm_forward(x3, weight, bias, force_path="tiled", tile_lanes=128))
    assert jnp.allclose(out3, ref3, atol=1e-5, rtol=1e-5)

    # bf16 activations/weights: the gate math stays in f32 inside the kernel.
    xb = jax.random.normal(kx, (B, C, H, W), dtype=jnp.bfloat16)
    wb = (jax.random.normal(kw, (C, C), dtype=jnp.float32) * 0.1
          ).astype(jnp.bfloat16)
    bb = (jax.random.normal(kb, (C,), dtype=jnp.float32) * 0.1
          ).astype(jnp.bfloat16)
    refb = arm_reference(xb, wb, bb)
    outb = jax.block_until_ready(arm_forward(xb, wb, bb))
    assert jnp.allclose(outb.astype(jnp.float32), refb.astype(jnp.float32),
                        atol=2e-2, rtol=2e-2)

    print("KERNEL_OK")
</pallas_src>

<mosaic_0001>
module attributes {stable_mosaic.version = 11 : i64} {
  func.func @_arm_per_batch_kernel(%arg0: i32, %arg1: memref<1x8x256xf32, #tpu.memory_space<vmem>>, %arg2: memref<8x8xf32, #tpu.memory_space<vmem>>, %arg3: memref<8x1xf32, #tpu.memory_space<vmem>>, %arg4: memref<1x8x256xf32, #tpu.memory_space<vmem>>) attributes {dimension_semantics = [#tpu.dimension_semantics<parallel>], iteration_bounds = array<i64: 2>, scalar_prefetch = 0 : i64, scratch_operands = 0 : i64, tpu.core_type = #tpu.core_type<tc>, window_params = [{transform_indices = @transform_0, window_bounds = array<i64: 1, 8, 256>}, {pipeline_mode = #tpu.pipeline_mode<synchronous>, transform_indices = @transform_1, window_bounds = array<i64: 8, 8>}, {pipeline_mode = #tpu.pipeline_mode<synchronous>, transform_indices = @transform_2, window_bounds = array<i64: 8, 1>}, {transform_indices = @transform_3, window_bounds = array<i64: 1, 8, 256>}]} {
    %c0 = arith.constant 0 : index
    %c0_0 = arith.constant 0 : index
    %c0_1 = arith.constant 0 : index
    %0 = vector.load %arg1[%c0, %c0_0, %c0_1] : memref<1x8x256xf32, #tpu.memory_space<vmem>>, vector<1x8x256xf32>
    %1 = vector.shape_cast %0 : vector<1x8x256xf32> to vector<8x256xf32>
    %cst = arith.constant dense<0.000000e+00> : vector<8xf32>
    %2 = vector.multi_reduction <add>, %1, %cst [1] : vector<8x256xf32> to vector<8xf32>
    %3 = vector.shape_cast %2 : vector<8xf32> to vector<8x1xf32>
    %cst_2 = arith.constant 3.906250e-03 : f32
    %4 = vector.broadcast %cst_2 : f32 to vector<8x1xf32>
    %5 = arith.mulf %3, %4 : vector<8x1xf32>
    %c0_3 = arith.constant 0 : index
    %c0_4 = arith.constant 0 : index
    %6 = vector.load %arg2[%c0_3, %c0_4] : memref<8x8xf32, #tpu.memory_space<vmem>>, vector<8x8xf32>
    %cst_5 = arith.constant dense<0.000000e+00> : vector<8x1xf32>
    %7 = tpu.matmul %6, %5, %cst_5 {dimension_numbers = #tpu.dot_dimension_numbers<[1], [0], [0], [1], [0, 0, 1, 1], [], []>} : vector<8x8xf32>, vector<8x1xf32>, vector<8x1xf32> -> vector<8x1xf32>
    %c0_6 = arith.constant 0 : index
    %c0_7 = arith.constant 0 : index
    %8 = vector.load %arg3[%c0_6, %c0_7] : memref<8x1xf32, #tpu.memory_space<vmem>>, vector<8x1xf32>
    %9 = arith.addf %7, %8 : vector<8x1xf32>
    %10 = arith.negf %9 : vector<8x1xf32>
    %11 = math.exp %10 : vector<8x1xf32>
    %cst_8 = arith.constant 1.000000e+00 : f32
    %12 = vector.broadcast %cst_8 : f32 to vector<8x1xf32>
    %13 = arith.addf %12, %11 : vector<8x1xf32>
    %14 = arith.divf %12, %13 : vector<8x1xf32>
    %c0_9 = arith.constant 0 : index
    %c0_10 = arith.constant 0 : index
    %c0_11 = arith.constant 0 : index
    %15 = vector.load %arg1[%c0_9, %c0_10, %c0_11] : memref<1x8x256xf32, #tpu.memory_space<vmem>>, vector<1x8x256xf32>
    %16 = vector.shape_cast %15 : vector<1x8x256xf32> to vector<8x256xf32>
    %17 = vector.broadcast %14 : vector<8x1xf32> to vector<8x256xf32>
    %18 = arith.mulf %16, %17 : vector<8x256xf32>
    %c0_12 = arith.constant 0 : index
    %c0_13 = arith.constant 0 : index
    %c0_14 = arith.constant 0 : index
    %19 = vector.load %arg4[%c0_12, %c0_13, %c0_14] : memref<1x8x256xf32, #tpu.memory_space<vmem>>, vector<1x8x256xf32>
    %20 = vector.shape_cast %19 : vector<1x8x256xf32> to vector<8x256xf32>
    %21 = vector.shape_cast %18 : vector<8x256xf32> to vector<1x8x256xf32>
    tpu.vector_store %arg4[%c0_12, %c0_13, %c0_14], %21 {strides = array<i32>} : memref<1x8x256xf32, #tpu.memory_space<vmem>>, vector<1x8x256xf32>,
    return
  }
  func.func @transform_0(%arg0: i32) -> (i32, i32, i32) {
    %c0_i32 = arith.constant 0 : i32
    %c0_i32_0 = arith.constant 0 : i32
    %c0_i32_1 = arith.constant 0 : i32
    return %arg0, %c0_i32, %c0_i32_0 : i32, i32, i32
  }
  func.func @transform_1(%arg0: i32) -> (i32, i32) {
    %c0_i32 = arith.constant 0 : i32
    %c0_i32_0 = arith.constant 0 : i32
    %c0_i32_1 = arith.constant 0 : i32
    return %c0_i32, %c0_i32_0 : i32, i32
  }
  func.func @transform_2(%arg0: i32) -> (i32, i32) {
    %c0_i32 = arith.constant 0 : i32
    %c0_i32_0 = arith.constant 0 : i32
    %c0_i32_1 = arith.constant 0 : i32
    return %c0_i32, %c0_i32_0 : i32, i32
  }
  func.func @transform_3(%arg0: i32) -> (i32, i32, i32) {
    %c0_i32 = arith.constant 0 : i32
    %c0_i32_0 = arith.constant 0 : i32
    %c0_i32_1 = arith.constant 0 : i32
    return %arg0, %c0_i32, %c0_i32_0 : i32, i32, i32
  }
}

</mosaic_0001>

<bundles_post_ra>
// kernel: tpu_custom_call.1
= control target key start
LH: loop header
LB: loop body
LE: loop exit
PB: predicated region body
PF: predicated region fallthrough
CT: control target
= control target key end

     0   :  { %8 = vsyncpa [#allocation3], 0  ;;  %s724_s0 = inlined_call_operand.hbm [shape: f32[2,8,256], index: 0, kind: input, shape index: {}]   ;;  %s725_s1 = inlined_call_operand.vmem [shape: f32[8,8], index: 1, kind: input, shape index: {}]   ;;  %s726_s2 = inlined_call_operand.vmem [shape: f32[8,1], index: 2, kind: input, shape index: {}]   ;;  %s727_s3 = inlined_call_operand.hbm [shape: f32[2,8,256], index: 3, kind: output, shape index: {}]  }
   0x1   :  { %10 = vsyncpa [#allocation3 + $0x1], 0 }
   0x2   :  { %11 = vsyncpa [#allocation4], 0 }
   0x3   :  { %13 = vsyncpa [#allocation4 + $0x1], 0  ;;  %s567_s12 = smov 0   ;;  %s569_s13 = smov 0  }
   0x4   :  { %s571_s14 = smov 0   ;;  %s573_s15 = smov 0  }
   0x5 LB: > { %s588_s16 = sadd.s32 4294967295, %s540_s15   ;;  %s369_s17 = sadd.s32 4294967294, %s540_s15   ;;  %s540_s15 = sphi %s573_s15, %s744_s15   ;;  %s536_s14 = sphi %s571_s14, %s743_s14   ;;  %s532_s13 = sphi %s569_s13, %s742_s13   ;;  %s528_s12 = sphi %s567_s12, %s741_s12  }
   0x6   : > { %s592_s18 = sadd.s32 1, %s540_s15   ;;  %s26_s19 = sadd.s32 1, %s536_s14 }
   0x7   : > { %s23_s20 = ssub.s32 %s540_s15, %s592_s18  ;;  %p33_p0 = scmp.ne.s32.totalorder %s536_s14, %s532_s13 }
   0x8   : > { %p24_p1 = scmp.eq.s32.totalorder %s23_s20, 0  ;;  %p34_p2 = scmp.eq.s32.totalorder %s540_s15, 0 }
   0x9   : > { %p39_p3 = scmp.ne.s32.totalorder %s532_s13, %s528_s12  ;;  %p40_p4 = scmp.eq.s32.totalorder %s588_s16, 0 }
   0xa   : > { %s604_s21 = scalar_select %p24_p1, %s536_s14, %s26_s19  }
   0xb   : > { %p606_p5 = por %p34_p2, %p33_p0  ;;  %p610_p6 = por %p40_p4, %p39_p3 }
   0xc   : > { %p105_p7 = scmp.eq.s32.totalorder %s588_s16, 1  ;;  %p111_p8 = scmp.eq.s32.totalorder %s369_s17, 1 }
   0xd   : > { %s731_s23 = scalar_select %p610_p6, 1, 0 }
   0xe   : > { %p406_p10 = scmp.lt.s32.totalorder %s540_s15, 2  ;;  %p617_p11 = por %p105_p7, %p33_p0 }
   0xf   : > { %p621_p12 = por %p111_p8, %p39_p3  ;;  %s137_s26 = sand.u32 1, %s536_s14  }
  0x10   : > { %s732_s24 = scalar_select %p617_p11, 1, 0 }
  0x11   : > { %s733_s25 = scalar_select %p621_p12, 1, 0 }
  0x12   : > { %s385_s27 = sshll.u32 %s540_s15, 8  ;;  %s372_s28 = sshll.u32 %s137_s26, 4 }
  0x13   : > { %s630_s4 = scalar_lea.hbm %s724_s0, %s385_s27  ;;  %s141_s5 = scalar_lea.vmem [#allocation2], %s372_s28 }
  0x14   : > { %s149_s6 = sshll.u32 %s141_s5, 4  ;;  %p634_p13 = pnand %p406_p10, %p606_p5  ;;  %s638_s6 = int_to_ptr.vmem [resolvable:$true] %s149_s6 }
  0x15   : > { %s138_s8 = scalar_lea.sflag [#allocation3], %s137_s26  ;;  %s448_s9 = scalar_lea.hbm %s630_s4, 256 }
  0x16   : > { %p449_p2 = scmp.ne.s32.totalorder %s630_s4, %s448_s9  ;;  %p450_p3 = pneg %p634_p13 }
  0x17   : > { %s453_s17 = scalar_lea.hbm %s724_s0, 512  ;;  %p454_p5 = scmp.lt.s32.totalorder %s630_s4, %s724_s0 }
  0x18   : > { %p451_p4 = pnand %p450_p3, %p449_p2  ;;  %p455_p8 = scmp.lt.s32.totalorder %s453_s17, %s448_s9 }
  0x1a   : > { %p452_p7 = pneg %p451_p4  ;;  %p456_p10 = por %p455_p8, %p454_p5 }
  0x1c   : > { %p457_p9 = pnand %p456_p10, %p452_p7 }
  0x1e   : > { %460 = shalt.err (!%p457_p9)
}
  0x1f   : > { %s461_s22 = scalar_lea.vmem %s638_s6, 256  ;;  %s542_s26 = smov [#allocation2]  }
  0x20   : > { %p462_p0 = scmp.ne.s32.totalorder %s638_s6, %s461_s22  ;;  %s466_s27 = sshll.u32 %s542_s26, 4  ;;  %s467_s27 = int_to_ptr.vmem [resolvable:$false] %s466_s27 }
  0x21   : > { %s468_s28 = scalar_lea.vmem %s467_s27, 512  ;;  %p469_p4 = scmp.lt.s32.totalorder %s638_s6, %s467_s27 }
  0x22   : > { %p464_p1 = pnand %p462_p0, %p450_p3  ;;  %p470_p12 = scmp.lt.s32.totalorder %s468_s28, %s461_s22 }
  0x24   : > { %p465_p2 = pneg %p464_p1  ;;  %p471_p11 = por %p470_p12, %p469_p4 }
  0x26   : > { %p472_p6 = pnand %p471_p11, %p465_p2 }
  0x28   : > { %475 = shalt.err (!%p472_p6)
}
  0x29   : > { %401 = dma.hbm_to_vmem [thread:$0]  (!%p634_p13), %s630_s4, 256, %s638_s6, %s138_s8  }
  0x2a   : > { %p735_p9 = scmp.lt.s32.totalorder %s540_s15, 3  ;;  %p736_p7 = scmp.ge.s32.totalorder %s540_s15, 1 }
  0x2c   : > { %p155_p0 = pnand %p736_p7, %p735_p9 }
  0x2d   : > { %s665_s29 = sand.u32 (!%p155_p0), 1, %s532_s13   ;;  %p737_p6 = scmp.ne.s32.totalorder (!%p155_p0), %s731_s23, 0 }
  0x2e   : > { %158 = sbr.rel (%p155_p0) target bundleno = 562 (0x232), region = 32  ;;  %s376_s30 = sshll.u32 (!%p155_p0), %s665_s29, 4 }
  0x2f   : > { %s161_s5 = scalar_lea.sflag (!%p155_p0), [#allocation3], %s665_s29  ;;  %s164_s7 = scalar_lea.vmem (!%p155_p0), [#allocation2], %s376_s30 }
  0x33   : > { %519 = dma.done.wait (%p737_p6), %s161_s5, 256  }
  0x34   : > { %521 = vsyncadd (%p737_p6), %s161_s5, 4294967040  ;;  %v187_v0 = vld [vmem:[%s164_s7] sm:$0xff]  ;;  %v188_v1 = vld [vmem:[%s164_s7 + $0x8] sm:$0xff]  ;;  %v543_v3 = vmov 0.0   ;;  %vm544_vm0 = vmmov 0   ;;  %vm195_vm1 = vcmask 64512  }
  0x35   : > { %v189_v2 = vadd.f32 %v188_v1, %v187_v0  ;;  %389 = vmatprep.subr.mxu0 %v543_v3  ;;  %391 = vmatprep.mubr.msk.f32.mxu0 %vm544_vm0, %v543_v3  ;;  %v193_v6 = vld [vmem:[%s725_s1] sm:$0xff]  ;;  %v545_v7 = vmov 0   ;;  %s386_s9 = sshll.u32 %s588_s16, 8  ;;  %s186_s10 = scalar_lea.vmem [#allocation5], %s376_s30 }
  0x36   : > { %443 = vset.pattern.permute.xlu0 %v545_v7  ;;  %v194_v8 = vld [vmem:[%s726_s2] sm:$0xff]  ;;  %s299_s11 = sshll.u32 %s186_s10, 4  ;;  %s687_s20 = scalar_lea.hbm %s727_s3, %s386_s9  ;;  %s300_s11 = int_to_ptr.vmem [resolvable:$true] %s299_s11 }
  0x37   : > { %190 = vadd.xlane.f32.xlu0 %v189_v2  ;;  %s285_s22 = scalar_lea.sflag [#allocation4], %s665_s29  ;;  %s476_s26 = scalar_lea.vmem %s300_s11, 256 }
  0x38   : > { %p477_p11 = scmp.ne.s32.totalorder %s300_s11, %s476_s26  ;;  %p738_p12 = scmp.ne.s32.totalorder %s732_s24, 0 }
  0x39   : > { %s546_s16 = smov [#allocation5]  }
  0x3a   : > { %p478_p13 = pnand %p477_p11, %p738_p12  ;;  %s480_s27 = sshll.u32 %s546_s16, 4  ;;  %s481_s27 = int_to_ptr.vmem [resolvable:$false] %s480_s27 }
  0x3b   : > { %s482_s28 = scalar_lea.vmem %s481_s27, 512  ;;  %p483_p3 = scmp.lt.s32.totalorder %s300_s11, %s481_s27 }
  0x3c   : > { %p479_p1 = pneg %p478_p13  ;;  %p484_p5 = scmp.lt.s32.totalorder %s482_s28, %s476_s26 }
  0x3e   : > { %p485_p8 = por %p484_p5, %p483_p3 }
  0x40   : > { %p486_p10 = pnand %p485_p8, %p479_p1 }
  0xc0   : > { %v191_v4 = vpop.xlane.xlu0 %190 }
  0xc1   : > { %v192_v5 = vmul.f32 0.00390625, %v191_v4 }
  0xc3   : > { %390 = vmatpush3.msra.mxu0 %v192_v5 }
  0xc4   : > { %392 = vmatmul.mubr.msk.f32.vlgmr.msra.gmra.mxu0 %vm195_vm1, %v193_v6 }
 0x184   : > { %v265_v9 = vpop.f32.mrf.mxu0 }
 0x185   : > { %v266_v10 = vadd.f32 %v265_v9, %v194_v8 }
 0x186   : > { %v393_v11 = vpop.f32.mrf.mxu0 }
 0x187   : > { %v379_v12 = vmul.f32 -1.442695, %v266_v10 }
 0x189   : > { %444 = vpow2.f32 %v379_v12 }
 0x196   : > { %v445_v13 = vpop.eup %444 }
 0x197   : > { %v272_v14 = vadd.f32 1.0, %v445_v13 }
 0x199   : > { %446 = vrcp.f32 %v272_v14 }
 0x1a6   : > { %v447_v15 = vpop.eup %446 }
 0x1a7   : > { %277 = vperm.xlu0 %443, %v447_v15  }
 0x222   : > { %v278_v16 = vpop.permute.xlu0 %277 }
 0x223   : > { %v280_v17 = vmul.f32 %v278_v16, %v187_v0  ;;  %v281_v18 = vmul.f32 %v278_v16, %v188_v1 }
 0x225   : > { %282 = vst [vmem:[%s186_s10] sm:$0xff] %v280_v17  ;;  %283 = vst [vmem:[%s186_s10 + $0x8] sm:$0xff] %v281_v18 }
 0x226   : > { %489 = shalt.err (!%p486_p10)
}
 0x227   : > { %s490_s30 = scalar_lea.hbm %s687_s20, 256  ;;  %s494_s7 = scalar_lea.hbm %s727_s3, 512 }
 0x228   : > { %p491_p2 = scmp.ne.s32.totalorder %s687_s20, %s490_s30  ;;  %p495_p7 = scmp.lt.s32.totalorder %s687_s20, %s727_s3 }
 0x229   : > { %p496_p0 = scmp.lt.s32.totalorder %s494_s7, %s490_s30 }
 0x22a   : > { %p492_p4 = pnand %p491_p2, %p738_p12 }
 0x22b   : > { %p497_p6 = por %p496_p0, %p495_p7 }
 0x22c   : > { %p493_p9 = pneg %p492_p4 }
 0x22e   : > { %p498_p11 = pnand %p497_p6, %p493_p9 }
 0x230   : > { %501 = shalt.err (!%p498_p11)
}
 0x231   : > { %396 = dma.vmem_to_hbm [thread:$0]  (%p738_p12), %s300_s11, 256, %s687_s20, %s285_s22  }
 0x232 PF: > { %s311_s23 = sand.u32 1, %s528_s12   ;;  %p739_p13 = scmp.ne.s32.totalorder %s733_s25, 0 }
 0x233   : > { %p740_p1 = scmp.ge.s32.totalorder %s540_s15, 2  ;;  %s312_s8 = scalar_lea.sflag [#allocation4], %s311_s23 }
 0x235   : > { %p403_p3 = pnand %p740_p1, %p739_p13 }
 0x237   : > { %p404_p5 = pneg %p403_p3 }
 0x239   : > { %523 = dma.done.wait (%p404_p5), %s312_s8, 256  }
 0x23a   : > { %525 = vsyncadd (%p404_p5), %s312_s8, 4294967040  ;;  %p16_p8 = scmp.ge.s32.totalorder %s592_s18, 4   ;;  %s741_s12 = smov %s532_s13 }
 0x23b   : > { %s742_s13 = smov %s536_s14  ;;  %s743_s14 = smov %s604_s21 }
 0x23c   : > { %s744_s15 = smov %s592_s18  ;;  %18 = sbr.rel (!%p16_p8) target bundleno = 5 (0x5), region = 77 }
 0x241   :  { %317 = vsyncpa [#allocation3], 1 }
 0x242   :  { %319 = vsyncpa [#allocation3 + $0x1], 1 }
 0x243   :  { %320 = vsyncpa [#allocation4], 1 }
 0x244   :  { %322 = vsyncpa [#allocation4 + $0x1], 1 }

</bundles_post_ra>
